<compile_context>
chip_gen: v5e
topology: v5e:2x2
jax: 0.10.0
libtpu: 0.0.40
codegen_flags: <defaults>
</compile_context>

<pallas_src>
import functools
import math

import jax
import jax.numpy as jnp
from jax import lax
from jax.experimental import pallas as pl
from jax.experimental.pallas import tpu as pltpu

# ResNet34 architecture constants (identical to the PyTorch module defaults).
ARCH_BLOCKS = (3, 4, 6, 3)
ARCH_CHANS = (64, 128, 256, 512)
ARCH_STRIDES = (1, 2, 2, 2)
STEM_CHANS = 64
N_CLASSES = 1000
BN_EPS = 1e-5


def _round_up(x: int, m: int) -> int:
    return (x + m - 1) // m * m


def _pick_tk(K: int, max_tk: int = 512) -> int:
    """K tile: a single K step when possible, otherwise minimise zero-padded K."""
    kp_min = _round_up(K, 128)
    if kp_min <= max_tk:
        return kp_min                       # e.g. stem K=147 -> one 256-wide step
    best_tk, best_kp = 128, _round_up(K, 128)
    for tk in (256, 384, 512):              # prefer the largest tile among minimal padding
        kp = _round_up(K, tk)
        if kp <= best_kp:
            best_tk, best_kp = tk, kp
    return best_tk                          # K=576->128, K=1152/2304->384, K=4608->512


def _pick_tile_m(M: int, max_tm: int = 1024) -> int:
    """Row tile for elementwise kernels: large (less per-step overhead), minimal padding."""
    m8 = _round_up(M, 8)
    if m8 <= max_tm:
        return m8
    best, best_waste = max_tm, _round_up(M, max_tm) - M
    for tm in range(max_tm, 255, -8):
        waste = _round_up(M, tm) - M
        if waste < best_waste:
            best, best_waste = tm, waste
            if waste == 0:
                break
    return best


def _lane_pack_factor(M: int, C: int) -> int:
    """How many C-wide rows to pack into one 128-lane row (C=64 -> 2)."""
    if C < 128 and 128 % C == 0 and M % (128 // C) == 0:
        return 128 // C
    return 1


# =============================================================================
# Tiled GEMM kernel with fused bias and (optional) fused BN partial statistics.
# Backs every conv (via im2col) and the FC head.
# =============================================================================
def _matmul_kernel(x_ref, w_ref, b_ref, *refs, with_stats):
    if with_stats:
        o_ref, sum_ref, sq_ref, acc_ref = refs
    else:
        o_ref, acc_ref = refs
    k = pl.program_id(2)

    @pl.when(k == 0)
    def _init():
        acc_ref[...] = jnp.zeros_like(acc_ref)

    a = x_ref[...]
    b = w_ref[...]
    if a.dtype != jnp.bfloat16:            # inputs are normally already bf16 in HBM
        a = a.astype(jnp.bfloat16)
    if b.dtype != jnp.bfloat16:
        b = b.astype(jnp.bfloat16)
    acc_ref[...] += jnp.dot(a, b, preferred_element_type=jnp.float32)

    @pl.when(k == pl.num_programs(2) - 1)
    def _finalize():
        # Bias fused into the K-epilogue: steady-state body is pure MXU + accumulate.
        y = acc_ref[...] + b_ref[...]
        o_ref[...] = y.astype(o_ref.dtype)
        if with_stats:
            # Per-tile column sum / sum-of-squares (f32), spread over 8 sublanes so
            # the side outputs stay (8,128)-aligned; the wrapper just sums the rows.
            s = jnp.sum(y, axis=0, keepdims=True) * 0.125
            q = jnp.sum(y * y, axis=0, keepdims=True) * 0.125
            sum_ref[...] = jnp.broadcast_to(s, sum_ref.shape)
            sq_ref[...] = jnp.broadcast_to(q, sq_ref.shape)


def matmul_pallas(x, w, bias=None, *, out_dtype=None, with_stats=False,
                  tm=512, tn=None, tk=None):
    """y = x @ w (+ bias).  x:(M,K), w:(K,N) stored pre-transposed.
    with_stats=True additionally returns per-column sum and sum-of-squares of y
    (computed from the f32 accumulator; zero-padded rows contribute zero)."""
    M, K = x.shape
    Kw, N = w.shape
    assert K == Kw
    out_dtype = out_dtype or x.dtype
    if with_stats:
        assert bias is None, "stats path assumes padded rows contribute exactly zero"

    # Tiles: multiples of (8, 128).  tn=256 for wide layers (fills a 256-wide MXU),
    # tn=128 for N<=256 so v7x keeps >=2 blocks on a parallel axis (and matches
    # v5e's 128-wide MXU).  tk chosen to minimise zero-padded K steps.
    tm_e = min(tm, _round_up(M, 8))
    if tn is None:
        tn = 256 if N >= 512 else 128
    tn_e = min(tn, _round_up(N, 128))
    tk_e = tk if tk is not None else _pick_tk(K)
    tk_e = min(tk_e, _round_up(K, 128))
    Mp, Np, Kp = _round_up(M, tm_e), _round_up(N, tn_e), _round_up(K, tk_e)

    xp = x if (Mp == M and Kp == K) else jnp.pad(x, ((0, Mp - M), (0, Kp - K)))
    wp = w if (Kp == K and Np == N) else jnp.pad(w, ((0, Kp - K), (0, Np - N)))
    if bias is None:
        bp = jnp.zeros((1, Np), jnp.float32)
    else:
        bp = bias.reshape(1, N).astype(jnp.float32)
        if Np != N:
            bp = jnp.pad(bp, ((0, 0), (0, Np - N)))

    gM, gN, gK = Mp // tm_e, Np // tn_e, Kp // tk_e

    out_shapes = [jax.ShapeDtypeStruct((Mp, Np), out_dtype)]
    out_specs = [pl.BlockSpec((tm_e, tn_e), lambda i, j, k: (i, j))]
    if with_stats:
        out_shapes += [jax.ShapeDtypeStruct((gM * 8, Np), jnp.float32)] * 2
        out_specs += [pl.BlockSpec((8, tn_e), lambda i, j, k: (i, j))] * 2

    flops = 2 * Mp * Np * Kp
    bytes_accessed = (xp.size * xp.dtype.itemsize + wp.size * wp.dtype.itemsize
                      + bp.size * 4 + Mp * Np * jnp.dtype(out_dtype).itemsize)

    # bf16 tiles (tm=512, tn=256, tk<=512): double-buffered footprint ~2.5 MiB,
    # safe on v5e/v6e (128 MiB VMEM) and on v7x (64 MiB).
    # TODO(synk): on v5e, pipeline_mode=pl.Buffered(3) on the weight spec could
    # further hide weight DMA on the small-M late-stage GEMMs.
    outs = pl.pallas_call(
        functools.partial(_matmul_kernel, with_stats=with_stats),
        out_shape=out_shapes,
        grid=(gM, gN, gK),
        in_specs=[
            pl.BlockSpec((tm_e, tk_e), lambda i, j, k: (i, k)),
            pl.BlockSpec((tk_e, tn_e), lambda i, j, k: (k, j)),
            pl.BlockSpec((1, tn_e), lambda i, j, k: (0, j)),
        ],
        out_specs=out_specs,
        scratch_shapes=[pltpu.VMEM((tm_e, tn_e), jnp.float32)],
        compiler_params=pltpu.CompilerParams(
            dimension_semantics=("parallel", "parallel", "arbitrary"),
            vmem_limit_bytes=32 * 1024 * 1024,
        ),
        cost_estimate=pl.CostEstimate(
            flops=flops, transcendentals=0, bytes_accessed=bytes_accessed),
    )(xp, wp, bp)

    out = outs[0]
    if Mp != M or Np != N:
        out = out[:M, :N]
    if not with_stats:
        return out
    col_sum = jnp.sum(outs[1][:, :N], axis=0)
    col_sq = jnp.sum(outs[2][:, :N], axis=0)
    return out, col_sum, col_sq


def linear_pallas(x, w_kn, bias=None, *, out_dtype=jnp.float32):
    """Linear: x @ W^T + b, with W stored pre-transposed as (in, out)."""
    *lead, K = x.shape
    M = int(math.prod(lead)) if lead else 1
    out = matmul_pallas(x.reshape(M, K), w_kn, bias, out_dtype=out_dtype)
    return out.reshape(*lead, w_kn.shape[1])


# =============================================================================
# Conv2d (bias=False) = im2col + Pallas GEMM (with fused BN partial stats), NHWC.
# =============================================================================
def conv2d_nhwc(x, w_kn, *, k, stride, padding, with_stats=False,
                out_dtype=jnp.bfloat16):
    """Conv2d with weight stored pre-transposed as (k*k*in_c, out_c) in bf16."""
    N, H, W, C = x.shape
    KK, out_c = w_kn.shape
    assert KK == k * k * C
    Ho = (H + 2 * padding - k) // stride + 1
    Wo = (W + 2 * padding - k) // stride + 1
    if padding:
        x = jnp.pad(x, ((0, 0), (padding, padding), (padding, padding), (0, 0)))
    # TODO(synk): im2col patch extraction stays XLA glue (done at bf16 to halve the
    # traffic); blocking the conv over output rows inside the kernel would remove it.
    patches = []
    for r in range(k):
        for s in range(k):
            patches.append(x[:, r:r + stride * (Ho - 1) + 1:stride,
                              s:s + stride * (Wo - 1) + 1:stride, :])
    cols = jnp.stack(patches, axis=3).reshape(N * Ho * Wo, k * k * C)
    cols = cols.astype(jnp.bfloat16)

    if with_stats:
        out2d, csum, csq = matmul_pallas(cols, w_kn, None, out_dtype=out_dtype,
                                         with_stats=True)
        m = N * Ho * Wo
        mean = csum / m
        var = jnp.maximum(csq / m - mean * mean, 0.0)   # torch.var(unbiased=False)
        return out2d.reshape(N, Ho, Wo, out_c), mean, var
    out2d = matmul_pallas(cols, w_kn, None, out_dtype=out_dtype)
    return out2d.reshape(N, Ho, Wo, out_c)


# =============================================================================
# Fused BatchNorm apply (+ residual add) (+ ReLU) elementwise kernels.
# =============================================================================
def _bn_apply_kernel(x_ref, s_ref, t_ref, o_ref, *, relu):
    y = x_ref[...].astype(jnp.float32) * s_ref[...] + t_ref[...]
    if relu:
        y = jnp.maximum(y, 0.0)
    o_ref[...] = y.astype(o_ref.dtype)


def _bn_apply_res_relu_kernel(x_ref, s_ref, t_ref, r_ref, o_ref):
    y = (x_ref[...].astype(jnp.float32) * s_ref[...] + t_ref[...]
         + r_ref[...].astype(jnp.float32))
    o_ref[...] = jnp.maximum(y, 0.0).astype(o_ref.dtype)


def batchnorm_apply_nhwc(x, bn, mean, var, *, relu, residual=None, eps=BN_EPS):
    """BatchNorm2d apply pass.  The reference module always takes its batch-stats
    branch (`if self.train:` is truthy) and normalises by (sqrt(var) + eps); the
    batch mean/var arrive precomputed (fused into the conv GEMM epilogue).
    Optionally fuses the residual add and the final ReLU.  Scale/shift are f32."""
    N, H, W, C = x.shape
    M = N * H * W
    inv = bn["gamma"].astype(jnp.float32) / (jnp.sqrt(var) + eps)
    shift = bn["beta"].astype(jnp.float32) - mean * inv

    # Lane-dense packing: view (M, C=64) as (M/2, 128) so stores are unmasked.
    rep = _lane_pack_factor(M, C)
    Cp, Mr = C * rep, M // rep
    x2d = x.reshape(Mr, Cp)
    scale2 = jnp.tile(inv, rep).reshape(1, Cp)
    shift2 = jnp.tile(shift, rep).reshape(1, Cp)

    tm = _pick_tile_m(Mr)
    Mp = _round_up(Mr, tm)
    xp = x2d if Mp == Mr else jnp.pad(x2d, ((0, Mp - Mr), (0, 0)))

    in_specs = [
        pl.BlockSpec((tm, Cp), lambda i: (i, 0)),
        pl.BlockSpec((1, Cp), lambda i: (0, 0)),
        pl.BlockSpec((1, Cp), lambda i: (0, 0)),
    ]
    args = [xp, scale2, shift2]
    if residual is None:
        kernel = functools.partial(_bn_apply_kernel, relu=relu)
    else:
        assert relu, "residual variant always applies the final ReLU"
        r2d = residual.reshape(Mr, Cp)
        rp = r2d if Mp == Mr else jnp.pad(r2d, ((0, Mp - Mr), (0, 0)))
        in_specs.append(pl.BlockSpec((tm, Cp), lambda i: (i, 0)))
        args.append(rp)
        kernel = _bn_apply_res_relu_kernel

    out = pl.pallas_call(
        kernel,
        out_shape=jax.ShapeDtypeStruct((Mp, Cp), x.dtype),
        grid=(Mp // tm,),
        in_specs=in_specs,
        out_specs=pl.BlockSpec((tm, Cp), lambda i: (i, 0)),
        compiler_params=pltpu.CompilerParams(dimension_semantics=("parallel",)),
    )(*args)
    if Mp != Mr:
        out = out[:Mr]
    return out.reshape(N, H, W, C)


# =============================================================================
# MaxPool2d(kernel_size=3, stride=2, padding=1) and AveragePool.
# =============================================================================
def _max_over_windows_kernel(x_ref, o_ref):
    r = x_ref[0]
    for t in range(1, x_ref.shape[0]):
        r = jnp.maximum(r, x_ref[t])
    o_ref[...] = r.astype(o_ref.dtype)


def maxpool_3x3_s2_p1_nhwc(x):
    N, H, W, C = x.shape
    Ho = (H + 2 - 3) // 2 + 1
    Wo = (W + 2 - 3) // 2 + 1
    neg = float(jnp.finfo(x.dtype).min)
    xp = jnp.pad(x, ((0, 0), (1, 1), (1, 1), (0, 0)), constant_values=neg)
    # TODO(synk): window extraction stays XLA glue; blocking the pool over output
    # rows with overlapping input windows in an index_map would remove this traffic.
    wins = []
    for r in range(3):
        for s in range(3):
            wins.append(xp[:, r:r + 2 * (Ho - 1) + 1:2, s:s + 2 * (Wo - 1) + 1:2, :])
    M = N * Ho * Wo
    rep = _lane_pack_factor(M, C)            # C=64 -> pack 2 rows per 128 lanes
    Cp, Mr = C * rep, M // rep
    stacked = jnp.stack(wins, axis=0).reshape(9, Mr, Cp)

    tm = _pick_tile_m(Mr)
    Mp = _round_up(Mr, tm)
    if Mp != Mr:
        stacked = jnp.pad(stacked, ((0, 0), (0, Mp - Mr), (0, 0)), constant_values=neg)
    out = pl.pallas_call(
        _max_over_windows_kernel,
        out_shape=jax.ShapeDtypeStruct((Mp, Cp), x.dtype),
        grid=(Mp // tm,),
        in_specs=[pl.BlockSpec((9, tm, Cp), lambda i: (0, i, 0))],
        out_specs=pl.BlockSpec((tm, Cp), lambda i: (i, 0)),
        compiler_params=pltpu.CompilerParams(dimension_semantics=("parallel",)),
    )(stacked)
    return out[:Mr].reshape(N, Ho, Wo, C)


def _avgpool_kernel(x_ref, o_ref):
    hw = x_ref.shape[0]
    acc = x_ref[0].astype(jnp.float32)
    for t in range(1, hw):
        acc = acc + x_ref[t].astype(jnp.float32)
    o_ref[...] = (acc * (1.0 / hw)).astype(o_ref.dtype)


def avgpool_nhwc(x):
    """AveragePool: mean over H and W -> (batch, channels).  f32 accumulation."""
    N, H, W, C = x.shape
    x3 = jnp.transpose(x.reshape(N, H * W, C), (1, 0, 2))   # (HW, N, C)
    return pl.pallas_call(
        _avgpool_kernel,
        out_shape=jax.ShapeDtypeStruct((N, C), x.dtype),
    )(x3)


# =============================================================================
# Parameters (mirroring the PyTorch inits; weights stored bf16, pre-transposed).
# =============================================================================
def init_resnet34_params(key):
    keys = iter(jax.random.split(key, 128))

    def conv_w(in_c, out_c, k):
        sf = 1.0 / math.sqrt(in_c * k * k)
        w = sf * (2.0 * jax.random.uniform(next(keys), (out_c, in_c, k, k),
                                           dtype=jnp.float32) - 1.0)
        # Pre-transpose once to (k*k*in_c, out_c) and store bf16: no per-call
        # transpose, half the weight DMA for the weight-bandwidth-bound layers.
        return jnp.transpose(w, (2, 3, 1, 0)).reshape(k * k * in_c, out_c
                                                      ).astype(jnp.bfloat16)

    def bn(c):
        return {"gamma": jnp.ones((c,), jnp.float32),
                "beta": jnp.zeros((c,), jnp.float32)}

    params = {"stem": {"conv": conv_w(3, STEM_CHANS, 7), "bn": bn(STEM_CHANS)},
              "groups": []}
    in_c = STEM_CHANS
    for n_blocks, out_c, stride in zip(ARCH_BLOCKS, ARCH_CHANS, ARCH_STRIDES):
        group = []
        for b in range(n_blocks):
            s = stride if b == 0 else 1
            cin = in_c if b == 0 else out_c
            block = {"conv1": conv_w(cin, out_c, 3), "bn1": bn(out_c),
                     "conv2": conv_w(out_c, out_c, 3), "bn2": bn(out_c)}
            if not (s == 1 and cin == out_c):
                block["down_conv"] = conv_w(cin, out_c, 1)
                block["down_bn"] = bn(out_c)
            group.append(block)
        params["groups"].append(group)
        in_c = out_c

    sf = 1.0 / math.sqrt(ARCH_CHANS[-1])
    params["fc"] = {
        "w_kn": (sf * (2.0 * jax.random.uniform(next(keys), (ARCH_CHANS[-1], N_CLASSES),
                                                dtype=jnp.float32) - 1.0)
                 ).astype(jnp.bfloat16),
        "bias": sf * (2.0 * jax.random.uniform(next(keys), (N_CLASSES,),
                                               dtype=jnp.float32) - 1.0),
    }
    # TODO(synk): running_mean / running_var / num_batches_tracked buffer updates
    # are training-time side effects that do not affect the forward output.
    return params


def _residual_block(x, bp, *, stride):
    left, m1, v1 = conv2d_nhwc(x, bp["conv1"], k=3, stride=stride, padding=1,
                               with_stats=True)
    left = batchnorm_apply_nhwc(left, bp["bn1"], m1, v1, relu=True)
    left, m2, v2 = conv2d_nhwc(left, bp["conv2"], k=3, stride=1, padding=1,
                               with_stats=True)
    if "down_conv" in bp:
        right, md, vd = conv2d_nhwc(x, bp["down_conv"], k=1, stride=stride,
                                    padding=0, with_stats=True)
        right = batchnorm_apply_nhwc(right, bp["down_bn"], md, vd, relu=False)
    else:
        right = x
    # bn2 + residual add + final ReLU fused into one Pallas kernel.
    return batchnorm_apply_nhwc(left, bp["bn2"], m2, v2, relu=True, residual=right)


def resnet34_forward(params, x_nchw):
    """x_nchw: (batch, 3, H, W) -> logits (batch, N_CLASSES)."""
    # NHWC + bf16 activations internally (f32 accumulators / BN statistics).
    x = jnp.transpose(x_nchw, (0, 2, 3, 1)).astype(jnp.bfloat16)

    # Stem: Conv 7x7/s2 -> BN -> ReLU -> MaxPool 3x3/s2/p1.
    x, m0, v0 = conv2d_nhwc(x, params["stem"]["conv"], k=7, stride=2, padding=3,
                            with_stats=True)
    x = batchnorm_apply_nhwc(x, params["stem"]["bn"], m0, v0, relu=True)
    x = maxpool_3x3_s2_p1_nhwc(x)

    for g, stride in enumerate(ARCH_STRIDES):
        blocks = params["groups"][g]
        x = _residual_block(x, blocks[0], stride=stride)
        tail = blocks[1:]
        if tail:
            # Identical-shape tail blocks run under lax.scan so each group's
            # Pallas kernels are traced/compiled once, not once per block.
            stacked = jax.tree_util.tree_map(lambda *leaves: jnp.stack(leaves), *tail)

            def tail_step(carry, bp):
                return _residual_block(carry, bp, stride=1), None

            x, _ = lax.scan(tail_step, x, stacked)

    x = avgpool_nhwc(x)                                            # (batch, 512)
    return linear_pallas(x, params["fc"]["w_kn"], params["fc"]["bias"],
                         out_dtype=jnp.float32)


# =============================================================================
if __name__ == "__main__":
    root = jax.random.PRNGKey(0)
    k_img, k_par, k_mm, k_cv = jax.random.split(root, 4)

    # --- check 1: tiled GEMM kernel vs jnp (exercises padding + fused bias) ---
    xm = jax.random.normal(k_mm, (96, 200), jnp.float32)
    wm = jax.random.normal(jax.random.fold_in(k_mm, 1), (200, 136),
                           jnp.float32) / math.sqrt(200.0)
    bm = jax.random.normal(jax.random.fold_in(k_mm, 2), (136,), jnp.float32)
    y = matmul_pallas(xm, wm, bm)
    y_ref = jnp.dot(xm.astype(jnp.bfloat16), wm.astype(jnp.bfloat16),
                    preferred_element_type=jnp.float32) + bm
    assert bool(jnp.allclose(y, y_ref, atol=2e-2, rtol=2e-2)), "GEMM kernel mismatch"

    # --- check 2: Pallas conv (im2col + GEMM + fused stats) vs lax conv -------
    cin, cout, kk, ss, pp = 16, 32, 3, 2, 1
    xc = jax.random.normal(k_cv, (2, 8, 8, cin), jnp.float32)
    w_oihw = (2.0 * jax.random.uniform(jax.random.fold_in(k_cv, 1),
                                       (cout, cin, kk, kk), dtype=jnp.float32) - 1.0
              ) / math.sqrt(cin * kk * kk)
    w_kn = jnp.transpose(w_oihw, (2, 3, 1, 0)).reshape(kk * kk * cin, cout
                                                       ).astype(jnp.bfloat16)
    yc, mc, vc = conv2d_nhwc(xc, w_kn, k=kk, stride=ss, padding=pp, with_stats=True)
    yc_ref = lax.conv_general_dilated(
        xc.astype(jnp.bfloat16),
        jnp.transpose(w_oihw, (2, 3, 1, 0)).astype(jnp.bfloat16),
        window_strides=(ss, ss), padding=((pp, pp), (pp, pp)),
        dimension_numbers=("NHWC", "HWIO", "NHWC"),
        preferred_element_type=jnp.float32)
    assert bool(jnp.allclose(yc.astype(jnp.float32), yc_ref,
                             atol=2e-2, rtol=2e-2)), "conv mismatch"
    m_ref = jnp.mean(yc_ref.reshape(-1, cout), axis=0)
    v_ref = jnp.var(yc_ref.reshape(-1, cout), axis=0)
    assert bool(jnp.allclose(mc, m_ref, atol=1e-2)), "fused BN mean mismatch"
    assert bool(jnp.allclose(vc, v_ref, atol=1e-2, rtol=1e-2)), "fused BN var mismatch"

    # --- full ResNet34 forward pass ---
    params = init_resnet34_params(k_par)
    x = jax.random.normal(k_img, (2, 3, 64, 64), jnp.float32)
    logits = jax.block_until_ready(jax.jit(resnet34_forward)(params, x))
    assert logits.shape == (2, N_CLASSES)
    assert bool(jnp.all(jnp.isfinite(logits)))
    print("KERNEL_OK")
</pallas_src>

<mosaic_0001>
module attributes {stable_mosaic.version = 11 : i64} {
  func.func @_matmul_kernel(%arg0: i32, %arg1: i32, %arg2: i32, %arg3: memref<96x256xf32, #tpu.memory_space<vmem>>, %arg4: memref<256x128xf32, #tpu.memory_space<vmem>>, %arg5: memref<1x128xf32, #tpu.memory_space<vmem>>, %arg6: memref<96x128xf32, #tpu.memory_space<vmem>>, %arg7: memref<96x128xf32, #tpu.memory_space<vmem>>) attributes {dimension_semantics = [#tpu.dimension_semantics<parallel>, #tpu.dimension_semantics<parallel>, #tpu.dimension_semantics<arbitrary>], iteration_bounds = array<i64: 1, 2, 1>, scalar_prefetch = 0 : i64, scratch_operands = 1 : i64, tpu.core_type = #tpu.core_type<tc>, window_params = [{transform_indices = @transform_0, window_bounds = array<i64: 96, 256>}, {transform_indices = @transform_1, window_bounds = array<i64: 256, 128>}, {transform_indices = @transform_2, window_bounds = array<i64: 1, 128>}, {transform_indices = @transform_3, window_bounds = array<i64: 96, 128>}]} {
    %c0_i32 = arith.constant 0 : i32
    %0 = arith.cmpi eq, %arg2, %c0_i32 : i32
    %1 = arith.extui %0 : i1 to i32
    %c0_i32_0 = arith.constant 0 : i32
    %2 = arith.cmpi ne, %1, %c0_i32_0 : i32
    scf.if %2 {
      %cst_10 = arith.constant 0.000000e+00 : f32
      %14 = vector.broadcast %cst_10 : f32 to vector<96x128xf32>
      %c0_11 = arith.constant 0 : index
      %c0_12 = arith.constant 0 : index
      %15 = vector.load %arg7[%c0_11, %c0_12] : memref<96x128xf32, #tpu.memory_space<vmem>>, vector<96x128xf32>
      tpu.vector_store %arg7[%c0_11, %c0_12], %14 {strides = array<i32>} : memref<96x128xf32, #tpu.memory_space<vmem>>, vector<96x128xf32>,
    } else {
    }
    %c0 = arith.constant 0 : index
    %c0_1 = arith.constant 0 : index
    %3 = vector.load %arg3[%c0, %c0_1] : memref<96x256xf32, #tpu.memory_space<vmem>>, vector<96x256xf32>
    %c0_2 = arith.constant 0 : index
    %c0_3 = arith.constant 0 : index
    %4 = vector.load %arg4[%c0_2, %c0_3] : memref<256x128xf32, #tpu.memory_space<vmem>>, vector<256x128xf32>
    %5 = arith.truncf %3 : vector<96x256xf32> to vector<96x256xbf16>
    %6 = arith.truncf %4 : vector<256x128xf32> to vector<256x128xbf16>
    %c0_4 = arith.constant 0 : index
    %c0_5 = arith.constant 0 : index
    %7 = vector.load %arg7[%c0_4, %c0_5] : memref<96x128xf32, #tpu.memory_space<vmem>>, vector<96x128xf32>
    %cst = arith.constant dense<0.000000e+00> : vector<96x128xf32>
    %8 = tpu.matmul %5, %6, %cst {dimension_numbers = #tpu.dot_dimension_numbers<[1], [0], [0], [1], [0, 0, 1, 1], [], []>} : vector<96x256xbf16>, vector<256x128xbf16>, vector<96x128xf32> -> vector<96x128xf32>
    %9 = arith.addf %7, %8 : vector<96x128xf32>
    %c0_6 = arith.constant 0 : index
    %c0_7 = arith.constant 0 : index
    %10 = vector.load %arg7[%c0_6, %c0_7] : memref<96x128xf32, #tpu.memory_space<vmem>>, vector<96x128xf32>
    tpu.vector_store %arg7[%c0_6, %c0_7], %9 {strides = array<i32>} : memref<96x128xf32, #tpu.memory_space<vmem>>, vector<96x128xf32>,
    %c0_i32_8 = arith.constant 0 : i32
    %11 = arith.cmpi eq, %arg2, %c0_i32_8 : i32
    %12 = arith.extui %11 : i1 to i32
    %c0_i32_9 = arith.constant 0 : i32
    %13 = arith.cmpi ne, %12, %c0_i32_9 : i32
    scf.if %13 {
      %c0_10 = arith.constant 0 : index
      %c0_11 = arith.constant 0 : index
      %14 = vector.load %arg7[%c0_10, %c0_11] : memref<96x128xf32, #tpu.memory_space<vmem>>, vector<96x128xf32>
      %c0_12 = arith.constant 0 : index
      %c0_13 = arith.constant 0 : index
      %15 = vector.load %arg5[%c0_12, %c0_13] : memref<1x128xf32, #tpu.memory_space<vmem>>, vector<1x128xf32>
      %16 = vector.broadcast %15 : vector<1x128xf32> to vector<96x128xf32>
      %17 = arith.addf %14, %16 : vector<96x128xf32>
      %c0_14 = arith.constant 0 : index
      %c0_15 = arith.constant 0 : index
      %18 = vector.load %arg6[%c0_14, %c0_15] : memref<96x128xf32, #tpu.memory_space<vmem>>, vector<96x128xf32>
      tpu.vector_store %arg6[%c0_14, %c0_15], %17 {strides = array<i32>} : memref<96x128xf32, #tpu.memory_space<vmem>>, vector<96x128xf32>,
    } else {
    }
    return
  }
  func.func @transform_0(%arg0: i32, %arg1: i32, %arg2: i32) -> (i32, i32) {
    %c0_i32 = arith.constant 0 : i32
    return %arg0, %arg2 : i32, i32
  }
  func.func @transform_1(%arg0: i32, %arg1: i32, %arg2: i32) -> (i32, i32) {
    %c0_i32 = arith.constant 0 : i32
    return %arg2, %arg1 : i32, i32
  }
  func.func @transform_2(%arg0: i32, %arg1: i32, %arg2: i32) -> (i32, i32) {
    %c0_i32 = arith.constant 0 : i32
    %c0_i32_0 = arith.constant 0 : i32
    return %c0_i32, %arg1 : i32, i32
  }
  func.func @transform_3(%arg0: i32, %arg1: i32, %arg2: i32) -> (i32, i32) {
    %c0_i32 = arith.constant 0 : i32
    return %arg0, %arg1 : i32, i32
  }
}

</mosaic_0001>

<bundles_post_ra>
// kernel: tpu_custom_call.1
= control target key start
LH: loop header
LB: loop body
LE: loop exit
PB: predicated region body
PF: predicated region fallthrough
CT: control target
= control target key end

     0   :  { %8 = vsyncpa [#allocation4], 0  ;;  %s1242_s0 = inlined_call_operand.hbm [shape: f32[96,256], index: 0, kind: input, shape index: {}]   ;;  %s1243_s1 = inlined_call_operand.hbm [shape: f32[256,256], index: 1, kind: input, shape index: {}]   ;;  %s1244_s2 = inlined_call_operand.hbm [shape: f32[1,256], index: 2, kind: input, shape index: {}]   ;;  %s1245_s3 = inlined_call_operand.hbm [shape: f32[96,256], index: 3, kind: output, shape index: {}]  }
   0x1   :  { %9 = vsyncpa [#allocation7], 0 }
   0x2   :  { %11 = vsyncpa [#allocation7 + $0x1], 0 }
   0x3   :  { %12 = vsyncpa [#allocation5], 0 }
   0x4   :  { %14 = vsyncpa [#allocation5 + $0x1], 0  ;;  %s1000_s12 = smov 0   ;;  %s1002_s13 = smov 0  }
   0x5   :  { %s1004_s14 = smov 0   ;;  %s1006_s15 = smov 0  }
   0x6   :  { %s1008_s16 = smov 0   ;;  %s1010_s17 = smov 0  }
   0x7 LB: > { %s35_s18 = sadd.s32 1, %s966_s16  ;;  %s76_s19 = sadd.s32 1, %s958_s14  ;;  %s970_s17 = sphi %s1010_s17, %s20_s17   ;;  %s966_s16 = sphi %s1008_s16, %s1256_s16   ;;  %s962_s15 = sphi %s1006_s15, %s1255_s15   ;;  %s958_s14 = sphi %s1004_s14, %s1254_s14   ;;  %s954_s13 = sphi %s1002_s13, %s1253_s13   ;;  %s950_s12 = sphi %s1000_s12, %s1252_s12  }
   0x8   : > { %p37_p0 = scmp.ge.s32.totalorder %s35_s18, 2  ;;  %p83_p1 = scmp.ne.s32.totalorder %s958_s14, %s954_s13 }
   0x9   : > { %p84_p2 = scmp.eq.s32.totalorder %s970_s17, 0  ;;  %p682_p4 = scmp.ge.s32.totalorder %s970_s17, 2 }
   0xa   : > { %s1258_s18 = smov (%p37_p0, %s35_s18), 0  ;;  %p734_p5 = scmp.lt.s32.totalorder %s970_s17, 2 }
   0xb   : > { %p1040_p3 = por %p84_p2, %p83_p1  ;;  %s72_s21 = ssub.s32 %s966_s16, %s1258_s18 }
   0xc   : > { %p74_p6 = scmp.eq.s32.totalorder %s72_s21, 0  ;;  %s187_s22 = sand.u32 1, %s970_s17  }
   0xd   : > { %s189_s23 = sand.u32 1, %s958_s14   ;;  %s684_s26 = sshll.u32 %s966_s16, 3 }
   0xe   : > { %s1051_s24 = scalar_select %p74_p6, %s958_s14, %s76_s19  }
   0xf   : > { %s683_s25 = sshll.u32 %s189_s23, 8  ;;  %s198_s29 = scalar_lea.hbm %s1243_s1, %s684_s26 }
  0x10   : > { %s199_s30 = sshll.u32 %s198_s29, 4  ;;  %s191_s4 = scalar_lea.vmem [#allocation6], %s683_s25  ;;  %s200_s30 = int_to_ptr.hbm [resolvable:$true] %s199_s30 }
  0x11   : > { %s201_s5 = sshll.u32 %s191_s4, 4  ;;  %p1063_p7 = pnand %p734_p5, %p1040_p3  ;;  %s202_s5 = int_to_ptr.vmem [resolvable:$true] %s201_s5 }
  0x12   : > { %s1067_s7 = scalar_lea.sflag [#allocation7], %s187_s22  ;;  %s972_s8 = smov 256  }
  0x13   : > { %s973_s9 = smov 128   ;;  %s974_s10 = smov 8  }
  0x14   : > { %725 = dma.hbm_to_vmem [thread:$0]  (!%p1063_p7), %s200_s30, 4096, %s202_s5, %s1067_s7, %s972_s8, %s973_s9, %s974_s10  }
  0x15   : > { %s1074_s11 = sadd.s32 4294967295, %s970_s17   ;;  %s679_s19 = sadd.s32 4294967294, %s970_s17  }
  0x16   : > { %p89_p8 = scmp.ne.s32.totalorder %s954_s13, %s950_s12  ;;  %p90_p9 = scmp.eq.s32.totalorder %s1074_s11, 0 }
  0x17   : > { %p141_p10 = scmp.eq.s32.totalorder %s1074_s11, 1  ;;  %p147_p11 = scmp.eq.s32.totalorder %s679_s19, 1 }
  0x18   : > { %p1083_p12 = por %p90_p9, %p89_p8  ;;  %p680_p13 = scmp.ge.s32.totalorder %s970_s17, 1 }
  0x19   : > { %p1091_p0 = por %p141_p10, %p83_p1  ;;  %p1095_p2 = por %p147_p11, %p89_p8 }
  0x1a   : > { %p154_p3 = scmp.lt.s32.totalorder %s970_s17, 3  ;;  %s171_s27 = sshll.u32 %s1242_s0, 4  ;;  %s172_s27 = int_to_ptr.hbm [resolvable:$true] %s171_s27 }
  0x1b   : > { %s975_s29 = smov [#allocation3]   ;;  %s217_s9 = scalar_lea.hbm %s1244_s2, %s966_s16 }
  0x1c   : > { %p1103_p5 = pnand %p680_p13, %p154_p3  ;;  %s173_s30 = sshll.u32 %s975_s29, 4  ;;  %s174_s30 = int_to_ptr.vmem [resolvable:$true] %s173_s30 }
  0x1d   : > { %s219_s10 = sshll.u32 %s217_s9, 4  ;;  %s214_s19 = scalar_lea.vmem [#allocation8], %s189_s23  ;;  %s220_s10 = int_to_ptr.hbm [resolvable:$true] %s219_s10 }
  0x1e   : > { %p718_p1 = pneg %p1103_p5  ;;  %s221_s25 = sshll.u32 %s214_s19, 4  ;;  %s222_s25 = int_to_ptr.vmem [resolvable:$true] %s221_s25 }
  0x1f   : > { %s976_s26 = smov 16   ;;  %230 = sbr.rel (%p1103_p5) target bundleno = 257 (0x101), region = 32 }
  0x20   : > { %p719_p6 = pnand %p718_p1, %p90_p9 }
  0x21   : > { %728 = dma.hbm_to_vmem [thread:$0]  (!%p1063_p7), %s220_s10, 16, %s222_s25, %s1067_s7  }
  0x22   : > { %721 = dma.hbm_to_vmem [thread:$0]  (!%p719_p6), %s172_s27, 3072, %s174_s30, [#allocation4], %s972_s8, %s972_s8, %s976_s26  }
  0x24   : > { %937 = dma.done.wait (%p90_p9), [#allocation4], 3072  }
  0x25   : > { %939 = vsyncadd (%p90_p9), [#allocation4], 4294964224  ;;  %s237_s23 = sand.u32 1, %s1074_s11   ;;  %s1130_s29 = sand.u32 1, %s954_s13  }
  0x26   : > { %s687_s4 = sshll.u32 %s1130_s29, 8  ;;  %s238_s8 = scalar_lea.sflag [#allocation7], %s237_s23 }
  0x27   : > { %s1133_s6 = scalar_lea.vmem [#allocation6], %s687_s4 }
  0x28   : > { %941 = dma.done.wait (%p1083_p12), %s238_s8, 4112  }
  0x29   : > { %943 = vsyncadd (%p1083_p12), %s238_s8, 4294963184  ;;  %v336_v0 = vld [vmem:[%s1133_s6 + $0x70] sm:$0xff]  ;;  %v337_v1 = vld [vmem:[%s1133_s6 + $0x78] sm:$0xff]  ;;  %s250_s7 = scalar_lea.vmem [#allocation8], %s1130_s29  ;;  %s707_s11 = smul.u32 96, %s1130_s29 }
  0x2a   : > { %v352_v2 = vld [vmem:[%s1133_s6 + $0xf0] sm:$0xff]  ;;  %v373_v3 = vpack.c.bf16 %v337_v1, %v336_v0  ;;  %v353_v4 = vld [vmem:[%s1133_s6 + $0xf8] sm:$0xff]  ;;  %v334_v5 = vld [vmem:[%s1133_s6 + $0x60] sm:$0xff]  ;;  %s688_s27 = sshll.u32 %s962_s15, 3  ;;  %s540_s15 = scalar_lea.sflag [#allocation5], %s1130_s29 }
  0x2b   : > { %v335_v6 = vld [vmem:[%s1133_s6 + $0x68] sm:$0xff]  ;;  %v381_v7 = vpack.c.bf16 %v353_v4, %v352_v2  ;;  %v350_v8 = vld [vmem:[%s1133_s6 + $0xe0] sm:$0xff]  ;;  %v332_v12 = vld [vmem:[%s1133_s6 + $0x50] sm:$0xff]  ;;  %s1178_s20 = scalar_lea.vmem [#allocation9], %s707_s11  ;;  %s553_s5 = scalar_lea.hbm %s1245_s3, %s688_s27 }
  0x2c   : > { %v351_v9 = vld [vmem:[%s1133_s6 + $0xe8] sm:$0xff]  ;;  %394 = vmatpush.bf16.msra.mxu0 %v373_v3  ;;  %691 = vmatpush.bf16.msra.mxu2 %v373_v3  ;;  %v372_v10 = vpack.c.bf16 %v335_v6, %v334_v5  ;;  %v333_v13 = vld [vmem:[%s1133_s6 + $0x58] sm:$0xff]  ;;  %v348_v14 = vld [vmem:[%s1133_s6 + $0xd0] sm:$0xff]  ;;  %s554_s9 = sshll.u32 %s1178_s20, 4  ;;  %s556_s10 = sshll.u32 %s553_s5, 4  ;;  %s555_s9 = int_to_ptr.vmem [resolvable:$true] %s554_s9  ;;  %s557_s10 = int_to_ptr.hbm [resolvable:$true] %s556_s10 }
  0x2d   : > { %433 = vmatpush.bf16.msra.mxu1 %v381_v7  ;;  %699 = vmatpush.bf16.msra.mxu3 %v381_v7  ;;  %v380_v11 = vpack.c.bf16 %v351_v9, %v350_v8  ;;  %v349_v15 = vld [vmem:[%s1133_s6 + $0xd8] sm:$0xff]  ;;  %v371_v16 = vpack.c.bf16 %v333_v13, %v332_v12  ;;  %v330_v18 = vld [vmem:[%s1133_s6 + $0x40] sm:$0xff]  ;;  %v331_v19 = vld [vmem:[%s1133_s6 + $0x48] sm:$0xff]  ;;  %s898_s19 = sshra.s32 %s557_s10, 4  ;;  %s904_s4 = scalar_lea.hbm %s1245_s3, 192  ;;  %s899_s19 = int_to_ptr.hbm [resolvable:$true] %s898_s19 }
  0x2e   : > { %v379_v17 = vpack.c.bf16 %v349_v15, %v348_v14  ;;  %v346_v20 = vld [vmem:[%s1133_s6 + $0xc0] sm:$0xff]  ;;  %v347_v21 = vld [vmem:[%s1133_s6 + $0xc8] sm:$0xff]  ;;  %v370_v22 = vpack.c.bf16 %v331_v19, %v330_v18  ;;  %v328_v24 = vld [vmem:[%s1133_s6 + $0x30] sm:$0xff]  ;;  %s900_s25 = scalar_lea.hbm %s899_s19, 96  ;;  %p905_p10 = scmp.lt.s32.totalorder %s899_s19, %s1245_s3 }
  0x2f   : > { %v378_v23 = vpack.c.bf16 %v347_v21, %v346_v20  ;;  %v329_v25 = vld [vmem:[%s1133_s6 + $0x38] sm:$0xff]  ;;  %v344_v26 = vld [vmem:[%s1133_s6 + $0xb0] sm:$0xff]  ;;  %v326_v30 = vld [vmem:[%s1133_s6 + $0x20] sm:$0xff]  ;;  %p901_p7 = scmp.ne.s32.totalorder %s899_s19, %s900_s25  ;;  %p906_p11 = scmp.lt.s32.totalorder %s904_s4, %s900_s25 }
  0x30   : > { %395 = vmatpush.bf16.msra.mxu0 %v372_v10  ;;  %692 = vmatpush.bf16.msra.mxu2 %v372_v10  ;;  %v345_v27 = vld [vmem:[%s1133_s6 + $0xb8] sm:$0xff]  ;;  %v369_v28 = vpack.c.bf16 %v329_v25, %v328_v24  ;;  %v327_v31 = vld [vmem:[%s1133_s6 + $0x28] sm:$0xff]  ;;  %v342_v32 = vld [vmem:[%s1133_s6 + $0xa0] sm:$0xff] }
  0x31   : > { %434 = vmatpush.bf16.msra.mxu1 %v380_v11  ;;  %700 = vmatpush.bf16.msra.mxu3 %v380_v11  ;;  %v377_v29 = vpack.c.bf16 %v345_v27, %v344_v26  ;;  %v343_v33 = vld [vmem:[%s1133_s6 + $0xa8] sm:$0xff]  ;;  %v368_v34 = vpack.c.bf16 %v327_v31, %v326_v30  ;;  %v324_v36 = vld [vmem:[%s1133_s6 + $0x10] sm:$0xff]  ;;  %v325_v37 = vld [vmem:[%s1133_s6 + $0x18] sm:$0xff]  ;;  %p902_p8 = pnand %p901_p7, %p1091_p0  ;;  %p907_p12 = por %p906_p11, %p905_p10 }
  0x32   : > { %v376_v35 = vpack.c.bf16 %v343_v33, %v342_v32  ;;  %v340_v38 = vld [vmem:[%s1133_s6 + $0x90] sm:$0xff]  ;;  %v341_v39 = vld [vmem:[%s1133_s6 + $0x98] sm:$0xff]  ;;  %v367_v40 = vpack.c.bf16 %v325_v37, %v324_v36  ;;  %v322_v42 = vld [vmem:[%s1133_s6] sm:$0xff] }
  0x33   : > { %v375_v41 = vpack.c.bf16 %v341_v39, %v340_v38  ;;  %v323_v43 = vld [vmem:[%s1133_s6 + $0x8] sm:$0xff]  ;;  %v338_v44 = vld [vmem:[%s1133_s6 + $0x80] sm:$0xff]  ;;  %v300_v47 = vld [vmem:[#allocation3 + $0x10] sm:$0xff]  ;;  %p903_p9 = pneg %p902_p8 }
  0x34   : > { %396 = vmatpush.bf16.msra.mxu0 %v371_v16  ;;  %693 = vmatpush.bf16.msra.mxu2 %v371_v16  ;;  %v339_v45 = vld [vmem:[%s1133_s6 + $0x88] sm:$0xff]  ;;  %v298_v46 = vld [vmem:[#allocation3] sm:$0xff]  ;;  %v366_v48 = vpack.c.bf16 %v323_v43, %v322_v42  ;;  %v312_v50 = vld [vmem:[#allocation3 + $0x70] sm:$0xff] }
  0x35   : > { %435 = vmatpush.bf16.msra.mxu1 %v379_v17  ;;  %701 = vmatpush.bf16.msra.mxu3 %v379_v17  ;;  %v310_v49 = vld [vmem:[#allocation3 + $0x60] sm:$0xff]  ;;  %v299_v51 = vld [vmem:[#allocation3 + $0x8] sm:$0xff]  ;;  %v374_v52 = vpack.c.bf16 %v339_v45, %v338_v44  ;;  %v301_v53 = vld [vmem:[#allocation3 + $0x18] sm:$0xff]  ;;  %v354_v56 = vpack.c.bf16 %v300_v47, %v298_v46  ;;  %p908_p13 = pnand %p907_p12, %p903_p9 }
  0x36   : > { %v311_v54 = vld [vmem:[#allocation3 + $0x68] sm:$0xff]  ;;  %v313_v55 = vld [vmem:[#allocation3 + $0x78] sm:$0xff]  ;;  %v360_v57 = vpack.c.bf16 %v312_v50, %v310_v49  ;;  %v355_v58 = vpack.c.bf16 %v301_v53, %v299_v51  ;;  %v302_v60 = vld [vmem:[#allocation3 + $0x20] sm:$0xff] }
  0x37   : > { %v361_v59 = vpack.c.bf16 %v313_v55, %v311_v54  ;;  %v304_v61 = vld [vmem:[#allocation3 + $0x30] sm:$0xff]  ;;  %v314_v62 = vld [vmem:[#allocation3 + $0x80] sm:$0xff]  ;;  %v303_v0 = vld [vmem:[#allocation3 + $0x28] sm:$0xff] }
  0x38   : > { %397 = vmatpush.bf16.msra.mxu0 %v370_v22  ;;  %694 = vmatpush.bf16.msra.mxu2 %v370_v22  ;;  %v316_v63 = vld [vmem:[#allocation3 + $0x90] sm:$0xff]  ;;  %v305_v1 = vld [vmem:[#allocation3 + $0x38] sm:$0xff]  ;;  %v315_v2 = vld [vmem:[#allocation3 + $0x88] sm:$0xff]  ;;  %v356_v4 = vpack.c.bf16 %v304_v61, %v302_v60 }
  0x39   : > { %436 = vmatpush.bf16.msra.mxu1 %v378_v23  ;;  %702 = vmatpush.bf16.msra.mxu3 %v378_v23  ;;  %v317_v3 = vld [vmem:[#allocation3 + $0x98] sm:$0xff]  ;;  %v362_v5 = vpack.c.bf16 %v316_v63, %v314_v62  ;;  %v357_v6 = vpack.c.bf16 %v305_v1, %v303_v0  ;;  %v306_v8 = vld [vmem:[#allocation3 + $0x40] sm:$0xff]  ;;  %v308_v9 = vld [vmem:[#allocation3 + $0x50] sm:$0xff] }
  0x3a   : > { %v363_v7 = vpack.c.bf16 %v317_v3, %v315_v2  ;;  %v318_v10 = vld [vmem:[#allocation3 + $0xa0] sm:$0xff]  ;;  %v320_v11 = vld [vmem:[#allocation3 + $0xb0] sm:$0xff]  ;;  %v307_v12 = vld [vmem:[#allocation3 + $0x48] sm:$0xff]  ;;  %v358_v16 = vpack.c.bf16 %v308_v9, %v306_v8 }
  0x3b   : > { %v309_v13 = vld [vmem:[#allocation3 + $0x58] sm:$0xff]  ;;  %v319_v14 = vld [vmem:[#allocation3 + $0xa8] sm:$0xff]  ;;  %v364_v17 = vpack.c.bf16 %v320_v11, %v318_v10  ;;  %v1175_v21 = vld [vmem:[%s250_s7] ss:$0 sm:$0xff] }
  0x3c   : > { %398 = vmatpush.bf16.msra.mxu0 %v369_v28  ;;  %695 = vmatpush.bf16.msra.mxu2 %v369_v28  ;;  %v321_v15 = vld [vmem:[#allocation3 + $0xb8] sm:$0xff]  ;;  %v359_v18 = vpack.c.bf16 %v309_v13, %v307_v12 }
  0x3d   : > { %437 = vmatpush.bf16.msra.mxu1 %v377_v29  ;;  %703 = vmatpush.bf16.msra.mxu3 %v377_v29  ;;  %v365_v19 = vpack.c.bf16 %v321_v15, %v319_v14 }
  0x40   : > { %399 = vmatpush.bf16.msra.mxu0 %v368_v34  ;;  %696 = vmatpush.bf16.msra.mxu2 %v368_v34 }
  0x41   : > { %438 = vmatpush.bf16.msra.mxu1 %v376_v35  ;;  %704 = vmatpush.bf16.msra.mxu3 %v376_v35 }
  0x44   : > { %400 = vmatpush.bf16.msra.mxu0 %v367_v40  ;;  %697 = vmatpush.bf16.msra.mxu2 %v367_v40 }
  0x45   : > { %439 = vmatpush.bf16.msra.mxu1 %v375_v41  ;;  %705 = vmatpush.bf16.msra.mxu3 %v375_v41 }
  0x48   : > { %401 = vmatpush.bf16.msra.mxu0 %v366_v48  ;;  %698 = vmatpush.bf16.msra.mxu2 %v366_v48 }
  0x49   : > { %440 = vmatpush.bf16.msra.mxu1 %v374_v52  ;;  %706 = vmatpush.bf16.msra.mxu3 %v374_v52 }
  0x4b   : > { %402 = vmatmul.bf16.vlgmr.msra.gmra.mxu0 %v354_v56  ;;  %417 = vmatmul.bf16.vlgmr.msra.gmra.mxu2 %v360_v57 }
  0x4c   : > { %441 = vmatmul.bf16.vlgmr.msra.gmra.mxu1 %v355_v58  ;;  %456 = vmatmul.bf16.vlgmr.msra.gmra.mxu3 %v361_v59 }
  0x5b   : > { %407 = vmatmul.bf16.gmra.mxu0 %v356_v4  ;;  %422 = vmatmul.bf16.gmra.mxu2 %v362_v5 }
  0x5c   : > { %446 = vmatmul.bf16.gmra.mxu1 %v357_v6  ;;  %461 = vmatmul.bf16.gmra.mxu3 %v363_v7 }
  0x6b   : > { %412 = vmatmul.bf16.gmra.mxu0 %v358_v16  ;;  %427 = vmatmul.bf16.gmra.mxu2 %v364_v17 }
  0x6c   : > { %451 = vmatmul.bf16.gmra.mxu1 %v359_v18  ;;  %466 = vmatmul.bf16.gmra.mxu3 %v365_v19 }
  0xc8   : > { %v403_v20 = vpop.f32.mrf.mxu0 }
  0xc9   : > { %v442_v22 = vpop.f32.mrf.mxu1 }
  0xca   : > { %v443_v23 = vadd.f32 %v442_v22, %v403_v20 }
  0xcc   : > { %v515_v24 = vadd.f32 %v1175_v21, %v443_v23 }
  0xce   : > { %527 = vst [vmem:[%s1178_s20] sm:$0xff] %v515_v24  ;;  %v418_v25 = vpop.f32.mrf.mxu2 }
  0xcf   : > { %v457_v26 = vpop.f32.mrf.mxu3 }
  0xd0   : > { %v458_v27 = vadd.f32 %v457_v26, %v418_v25  ;;  %v405_v28 = vpop.f32.mrf.mxu0 }
  0xd1   : > { %v444_v29 = vpop.f32.mrf.mxu1 }
  0xd2   : > { %v521_v30 = vadd.f32 %v1175_v21, %v458_v27  ;;  %v445_v31 = vadd.f32 %v444_v29, %v405_v28 }
  0xd4   : > { %533 = vst [vmem:[%s1178_s20 + $0x30] sm:$0xff] %v521_v30  ;;  %v516_v32 = vadd.f32 %v1175_v21, %v445_v31 }
  0xd6   : > { %528 = vst [vmem:[%s1178_s20 + $0x8] sm:$0xff] %v516_v32  ;;  %v420_v33 = vpop.f32.mrf.mxu2 }
  0xd7   : > { %v459_v34 = vpop.f32.mrf.mxu3 }
  0xd8   : > { %v460_v35 = vadd.f32 %v459_v34, %v420_v33  ;;  %v408_v36 = vpop.f32.mrf.mxu0 }
  0xd9   : > { %v447_v37 = vpop.f32.mrf.mxu1 }
  0xda   : > { %v522_v38 = vadd.f32 %v1175_v21, %v460_v35  ;;  %v448_v39 = vadd.f32 %v447_v37, %v408_v36 }
  0xdc   : > { %534 = vst [vmem:[%s1178_s20 + $0x38] sm:$0xff] %v522_v38  ;;  %v517_v40 = vadd.f32 %v1175_v21, %v448_v39 }
  0xde   : > { %529 = vst [vmem:[%s1178_s20 + $0x10] sm:$0xff] %v517_v40  ;;  %v423_v41 = vpop.f32.mrf.mxu2 }
  0xdf   : > { %v462_v42 = vpop.f32.mrf.mxu3 }
  0xe0   : > { %v463_v43 = vadd.f32 %v462_v42, %v423_v41  ;;  %v410_v44 = vpop.f32.mrf.mxu0 }
  0xe1   : > { %v449_v45 = vpop.f32.mrf.mxu1 }
  0xe2   : > { %v523_v46 = vadd.f32 %v1175_v21, %v463_v43  ;;  %v450_v47 = vadd.f32 %v449_v45, %v410_v44 }
  0xe4   : > { %535 = vst [vmem:[%s1178_s20 + $0x40] sm:$0xff] %v523_v46  ;;  %v518_v48 = vadd.f32 %v1175_v21, %v450_v47 }
  0xe6   : > { %530 = vst [vmem:[%s1178_s20 + $0x18] sm:$0xff] %v518_v48  ;;  %v425_v49 = vpop.f32.mrf.mxu2 }
  0xe7   : > { %v464_v50 = vpop.f32.mrf.mxu3 }
  0xe8   : > { %v465_v51 = vadd.f32 %v464_v50, %v425_v49  ;;  %v413_v52 = vpop.f32.mrf.mxu0 }
  0xe9   : > { %v452_v53 = vpop.f32.mrf.mxu1 }
  0xea   : > { %v524_v54 = vadd.f32 %v1175_v21, %v465_v51  ;;  %v453_v55 = vadd.f32 %v452_v53, %v413_v52 }
  0xec   : > { %536 = vst [vmem:[%s1178_s20 + $0x48] sm:$0xff] %v524_v54  ;;  %v519_v56 = vadd.f32 %v1175_v21, %v453_v55 }
  0xee   : > { %531 = vst [vmem:[%s1178_s20 + $0x20] sm:$0xff] %v519_v56  ;;  %v428_v57 = vpop.f32.mrf.mxu2 }
  0xef   : > { %v467_v58 = vpop.f32.mrf.mxu3 }
  0xf0   : > { %v468_v59 = vadd.f32 %v467_v58, %v428_v57  ;;  %v415_v60 = vpop.f32.mrf.mxu0 }
  0xf1   : > { %v454_v61 = vpop.f32.mrf.mxu1 }
  0xf2   : > { %v525_v62 = vadd.f32 %v1175_v21, %v468_v59  ;;  %v455_v63 = vadd.f32 %v454_v61, %v415_v60 }
  0xf4   : > { %537 = vst [vmem:[%s1178_s20 + $0x50] sm:$0xff] %v525_v62  ;;  %v520_v0 = vadd.f32 %v1175_v21, %v455_v63 }
  0xf6   : > { %532 = vst [vmem:[%s1178_s20 + $0x28] sm:$0xff] %v520_v0  ;;  %v430_v1 = vpop.f32.mrf.mxu2 }
  0xf7   : > { %v469_v2 = vpop.f32.mrf.mxu3 }
  0xf8   : > { %v470_v3 = vadd.f32 %v469_v2, %v430_v1 }
  0xfa   : > { %v526_v4 = vadd.f32 %v1175_v21, %v470_v3 }
  0xfc   : > { %538 = vst [vmem:[%s1178_s20 + $0x58] sm:$0xff] %v526_v4 }
  0xfd   : > { %911 = shalt.err (!%p908_p13)
}
  0xfe   : > { %s977_s29 = smov 128   ;;  %s978_s7 = smov 256  }
  0xff   : > { %s979_s11 = smov 8  }
 0x100   : > { %716 = dma.vmem_to_hbm [thread:$0]  (%p1091_p0), %s555_s9, 1536, %s557_s10, %s540_s15, %s977_s29, %s978_s7, %s979_s11  }
 0x101 PF: > { %s571_s20 = sand.u32 1, %s950_s12   ;;  %p730_p3 = pnand %p682_p4, %p1095_p2 }
 0x102   : > { %s572_s27 = scalar_lea.sflag [#allocation5], %s571_s20 }
 0x103   : > { %p731_p5 = pneg %p730_p3 }
 0x105   : > { %945 = dma.done.wait (%p731_p5), %s572_s27, 1536  }
 0x106   : > { %947 = vsyncadd (%p731_p5), %s572_s27, 4294965760  ;;  %s20_s17 = sadd.s32 1, %s970_s17   ;;  %s1252_s12 = smov %s954_s13 }
 0x107   : > { %p17_p1 = scmp.ge.s32.totalorder %s20_s17, 4   ;;  %s1253_s13 = smov %s958_s14 }
 0x108   : > { %s1254_s14 = smov %s1051_s24  ;;  %s1255_s15 = smov %s966_s16 }
 0x109   : > { %s1256_s16 = smov %s1258_s18  ;;  %19 = sbr.rel (!%p17_p1) target bundleno = 7 (0x7), region = 102 }
 0x10e   :  { %578 = vsyncpa [#allocation4], 1 }
 0x10f   :  { %580 = vsyncpa [#allocation4 + $0x1], 1 }
 0x110   :  { %581 = vsyncpa [#allocation7], 1 }
 0x111   :  { %583 = vsyncpa [#allocation7 + $0x1], 1 }
 0x112   :  { %584 = vsyncpa [#allocation5], 1 }
 0x113   :  { %586 = vsyncpa [#allocation5 + $0x1], 1 }

</bundles_post_ra>
